<compile_context>
chip_gen: v7x
topology: tpu7x:2x2x1
jax: 0.10.0
libtpu: 0.0.40
codegen_flags: <defaults>
</compile_context>

<pallas_src>
import numpy as np
import jax
import jax.numpy as jnp
from jax.experimental import pallas as pl
from jax.experimental.pallas import tpu as pltpu


def _round_up(x: int, m: int) -> int:
    return ((x + m - 1) // m) * m


def make_dynamic_embedding_kernel(dim_e: int, dim_t: int, n_ent: int, tb: int):
    """Kernel body for one batch tile of TB rows."""

    def kernel(ent_ref,    # (TB, 1)       int32  entity ids for this batch tile
               dt_ref,     # (TB, 1)       f32
               wb_ref,     # (2, dim_t)    f32    row 0 = w, row 1 = b (resident)
               tbl_ref,    # (n_ent, dim_e) f32   whole table, resident in VMEM
               out_ref):   # (TB, dim_e + dim_t) f32
        ids = ent_ref[...]                                          # (TB, 1) int32
        # One-hot gather on the MXU: (TB, n_ent) @ (n_ent, dim_e) -> (TB, dim_e).
        # Garbage ids (padded / ragged rows) simply produce all-zero one-hot rows;
        # those output rows are masked on store.
        iota = jax.lax.broadcasted_iota(jnp.int32, (tb, n_ent), 1)  # lane iota
        onehot = (iota == ids).astype(jnp.float32)                  # broadcast over lanes
        e = jnp.dot(onehot, tbl_ref[...], preferred_element_type=jnp.float32)

        w = wb_ref[0:1, :]                                          # (1, dim_t)
        b = wb_ref[1:2, :]                                          # (1, dim_t)
        t = jnp.cos(w * dt_ref[...] + b)                            # (TB, dim_t)

        # Single full-tile, lane-dense store (no narrow masked store stream).
        out_ref[...] = jnp.concatenate([e, t], axis=-1).astype(out_ref.dtype)

    return kernel


def dynamic_embedding(entities, dt, emb_table, w, b, *, tile_b: int = 256):
    """Pallas forward of DynamicEmbedding.

    entities : int  (B,)
    dt       : f32  (B, 1) or (B,)     (seq_len == 1 only)
    emb_table: f32  (n_ent, dim_e)
    w, b     : f32  (dim_t,)
    returns  : f32  (B, dim_e + dim_t)
    """
    B = entities.shape[0]
    n_ent, dim_e = emb_table.shape
    dim_t = w.shape[0]
    dim_ent = dim_e + dim_t

    if dt.ndim == 2 and dt.shape[1] != 1:
        raise ValueError(
            f"DynamicEmbedding kernel assumes seq_len == 1; got dt shape {dt.shape}. "
            "The PyTorch forward's .squeeze(1) + cat only works for seq_len == 1.")
    if dt.shape[0] != B:
        raise ValueError(f"entities batch {B} != dt batch {dt.shape[0]}")

    # Batch tile: sublane-aligned (multiple of 8), capped at tile_b (default 256).
    tb = min(tile_b, _round_up(B, 8))
    grid = (pl.cdiv(B, tb),)

    # Explicit choice: clamp out-of-range ids (torch would error instead).
    ent = jnp.clip(entities.astype(jnp.int32), 0, n_ent - 1).reshape(B, 1)
    dt2 = dt.reshape(B, 1).astype(jnp.float32)

    wb = jnp.stack([w.astype(jnp.float32), b.astype(jnp.float32)], axis=0)  # (2, dim_t)
    tbl = emb_table.astype(jnp.float32)   # must stay f32 for the exact one-hot gather

    kernel = make_dynamic_embedding_kernel(dim_e, dim_t, n_ent, tb)

    out = pl.pallas_call(
        kernel,
        out_shape=jax.ShapeDtypeStruct((B, dim_ent), jnp.float32),
        grid_spec=pltpu.PrefetchScalarGridSpec(
            num_scalar_prefetch=0,
            grid=grid,
            in_specs=[
                pl.BlockSpec((tb, 1), lambda i: (i, 0)),            # entity ids
                pl.BlockSpec((tb, 1), lambda i: (i, 0)),            # dt
                pl.BlockSpec((2, dim_t), lambda i: (0, 0),          # [w; b], resident,
                             pipeline_mode=pl.Buffered(1)),         #   single-buffered
                pl.BlockSpec((n_ent, dim_e), lambda i: (0, 0),      # table, resident,
                             pipeline_mode=pl.Buffered(1)),         #   single-buffered
            ],
            out_specs=pl.BlockSpec((tb, dim_ent), lambda i: (i, 0)),
        ),
        # VMEM budget at these sizes is trivial (table 32 KiB x1, out tile
        # (256,160) f32 x2 ~= 320 KiB); for large n_ent set vmem_limit_bytes
        # here (16 MiB scoped default on v5e, 32 MiB on v6e/v7x).
        # TODO(synk): on v7x consider pltpu.CORE_PARALLEL for the batch axis
        # once B > tb so the tiles split across the two TensorCores.
        compiler_params=pltpu.CompilerParams(
            dimension_semantics=("parallel",)),
    )(ent, dt2, wb, tbl)

    return out


if __name__ == "__main__":
    # Small shapes consistent with the module.
    n_ent = 64
    dim_t = 32
    dim_ent = 160               # dim_e = dim_ent - dim_t = 128
    dim_e = dim_ent - dim_t
    batch = 8
    seq_len = 1                 # forward's .squeeze(1) implies seq_len == 1

    key = jax.random.PRNGKey(0)
    k_emb, k_ent, k_dt = jax.random.split(key, 3)

    # Deterministic parameter init (same shapes as the nn.Module __init__).
    emb_table = jax.random.normal(k_emb, (n_ent, dim_e), dtype=jnp.float32)
    w = jnp.asarray(1.0 / 10.0 ** np.linspace(0, 9, dim_t), dtype=jnp.float32)
    b = jnp.zeros((dim_t,), dtype=jnp.float32)

    # Example inputs.
    entities = jax.random.randint(k_ent, (batch,), 0, n_ent, dtype=jnp.int32)
    dt = jax.random.uniform(k_dt, (batch, seq_len), dtype=jnp.float32) * 100.0

    out = dynamic_embedding(entities, dt, emb_table, w, b)
    out = jax.block_until_ready(out)

    # Pure-JAX reference (mirrors the PyTorch forward).
    t_ref = jnp.cos(w[None, None, :] * dt[:, :, None] + b[None, None, :])  # (B, 1, dim_t)
    t_ref = t_ref[:, 0, :]                                                 # squeeze(1)
    e_ref = emb_table[entities]                                            # (B, dim_e)
    ref = jnp.concatenate([e_ref, t_ref], axis=-1)

    assert out.shape == (batch, dim_ent)
    np.testing.assert_allclose(np.asarray(out), np.asarray(ref), rtol=1e-5, atol=1e-5)
    print("KERNEL_OK")
</pallas_src>

<mosaic_0001>
module attributes {stable_mosaic.version = 11 : i64} {
  func.func @kernel(%arg0: i32, %arg1: memref<8x1xi32, #tpu.memory_space<vmem>>, %arg2: memref<8x1xf32, #tpu.memory_space<vmem>>, %arg3: memref<2x32xf32, #tpu.memory_space<vmem>>, %arg4: memref<64x128xf32, #tpu.memory_space<vmem>>, %arg5: memref<8x160xf32, #tpu.memory_space<vmem>>) attributes {dimension_semantics = [#tpu.dimension_semantics<parallel>], iteration_bounds = array<i64: 1>, scalar_prefetch = 0 : i64, scratch_operands = 0 : i64, tpu.core_type = #tpu.core_type<tc>, window_params = [{transform_indices = @transform_0, window_bounds = array<i64: 8, 1>}, {transform_indices = @transform_1, window_bounds = array<i64: 8, 1>}, {pipeline_mode = #tpu.pipeline_mode<synchronous>, transform_indices = @transform_2, window_bounds = array<i64: 2, 32>}, {pipeline_mode = #tpu.pipeline_mode<synchronous>, transform_indices = @transform_3, window_bounds = array<i64: 64, 128>}, {transform_indices = @transform_4, window_bounds = array<i64: 8, 160>}]} {
    %c0 = arith.constant 0 : index
    %c0_0 = arith.constant 0 : index
    %0 = vector.load %arg1[%c0, %c0_0] : memref<8x1xi32, #tpu.memory_space<vmem>>, vector<8x1xi32>
    %1 = tpu.iota {dimensions = array<i32: 1>} : vector<8x64xi32>
    %2 = vector.broadcast %0 : vector<8x1xi32> to vector<8x64xi32>
    %3 = arith.cmpi eq, %1, %2 : vector<8x64xi32>
    %4 = arith.extui %3 : vector<8x64xi1> to vector<8x64xi32>
    %5 = arith.sitofp %4 : vector<8x64xi32> to vector<8x64xf32>
    %c0_1 = arith.constant 0 : index
    %c0_2 = arith.constant 0 : index
    %6 = vector.load %arg4[%c0_1, %c0_2] : memref<64x128xf32, #tpu.memory_space<vmem>>, vector<64x128xf32>
    %cst = arith.constant dense<0.000000e+00> : vector<8x128xf32>
    %7 = tpu.matmul %5, %6, %cst {dimension_numbers = #tpu.dot_dimension_numbers<[1], [0], [0], [1], [0, 0, 1, 1], [], []>} : vector<8x64xf32>, vector<64x128xf32>, vector<8x128xf32> -> vector<8x128xf32>
    %c0_3 = arith.constant 0 : index
    %c0_4 = arith.constant 0 : index
    %8 = vector.load %arg3[%c0_3, %c0_4] : memref<2x32xf32, #tpu.memory_space<vmem>>, vector<1x32xf32>
    %c1 = arith.constant 1 : index
    %c0_5 = arith.constant 0 : index
    %9 = vector.load %arg3[%c1, %c0_5] : memref<2x32xf32, #tpu.memory_space<vmem>>, vector<1x32xf32>
    %c0_6 = arith.constant 0 : index
    %c0_7 = arith.constant 0 : index
    %10 = vector.load %arg2[%c0_6, %c0_7] : memref<8x1xf32, #tpu.memory_space<vmem>>, vector<8x1xf32>
    %11 = vector.broadcast %8 : vector<1x32xf32> to vector<8x32xf32>
    %12 = vector.broadcast %10 : vector<8x1xf32> to vector<8x32xf32>
    %13 = arith.mulf %11, %12 : vector<8x32xf32>
    %14 = vector.broadcast %9 : vector<1x32xf32> to vector<8x32xf32>
    %15 = arith.addf %13, %14 : vector<8x32xf32>
    %16 = math.cos %15 : vector<8x32xf32>
    %17 = tpu.concatenate %7, %16 in 1 : vector<8x128xf32>, vector<8x32xf32> -> vector<8x160xf32>
    %c0_8 = arith.constant 0 : index
    %c0_9 = arith.constant 0 : index
    %18 = vector.load %arg5[%c0_8, %c0_9] : memref<8x160xf32, #tpu.memory_space<vmem>>, vector<8x160xf32>
    tpu.vector_store %arg5[%c0_8, %c0_9], %17 {strides = array<i32>} : memref<8x160xf32, #tpu.memory_space<vmem>>, vector<8x160xf32>,
    return
  }
  func.func @transform_0(%arg0: i32) -> (i32, i32) {
    %c0_i32 = arith.constant 0 : i32
    %c0_i32_0 = arith.constant 0 : i32
    return %arg0, %c0_i32 : i32, i32
  }
  func.func @transform_1(%arg0: i32) -> (i32, i32) {
    %c0_i32 = arith.constant 0 : i32
    %c0_i32_0 = arith.constant 0 : i32
    return %arg0, %c0_i32 : i32, i32
  }
  func.func @transform_2(%arg0: i32) -> (i32, i32) {
    %c0_i32 = arith.constant 0 : i32
    %c0_i32_0 = arith.constant 0 : i32
    %c0_i32_1 = arith.constant 0 : i32
    return %c0_i32, %c0_i32_0 : i32, i32
  }
  func.func @transform_3(%arg0: i32) -> (i32, i32) {
    %c0_i32 = arith.constant 0 : i32
    %c0_i32_0 = arith.constant 0 : i32
    %c0_i32_1 = arith.constant 0 : i32
    return %c0_i32, %c0_i32_0 : i32, i32
  }
  func.func @transform_4(%arg0: i32) -> (i32, i32) {
    %c0_i32 = arith.constant 0 : i32
    %c0_i32_0 = arith.constant 0 : i32
    return %arg0, %c0_i32 : i32, i32
  }
}

</mosaic_0001>

<bundles_post_ra>
// kernel: tpu_custom_call.1
= control target key start
LH: loop header
LB: loop body
LE: loop exit
PB: predicated region body
PF: predicated region fallthrough
CT: control target
= control target key end

     0   :  { %9 = vsyncpa [#allocation3], 0  ;;  %s477_s0 = inlined_call_operand.vmem [shape: s32[8,1], index: 0, kind: input, shape index: {}]   ;;  %s478_s1 = inlined_call_operand.vmem [shape: f32[8,1], index: 1, kind: input, shape index: {}]   ;;  %s479_s2 = inlined_call_operand.vmem [shape: f32[2,32], index: 2, kind: input, shape index: {}]   ;;  %s480_s3 = inlined_call_operand.hbm [shape: f32[64,128], index: 3, kind: input, shape index: {}]   ;;  %s481_s4 = inlined_call_operand.hbm [shape: f32[8,160], index: 4, kind: output, shape index: {}]  }
   0x1   :  { %10 = vsyncpa [#allocation4], 0  ;;  %s381_s15 = smov [#allocation2]   ;;  %s333_s19 = scalar_lea.hbm %s480_s3, 1024 }
   0x2   :  { %s22_s16 = sshll.u32 %s381_s15, 4  ;;  %p334_p0 = scmp.ne.s32.totalorder %s480_s3, %s333_s19  ;;  %s23_s16 = int_to_ptr.vmem [resolvable:$true] %s22_s16 }
   0x3   :  { %p337_p1 = scmp.lt.u32.totalorder %s333_s19, %s480_s3 }
   0x5   :  { %p339_p2 = pnand %p337_p1, %p334_p0 }
   0x7   :  { %342 = shalt.err (!%p339_p2)
}
   0x8   :  { %s343_s24 = scalar_lea.vmem %s23_s16, 1024  ;;  %p348_p4 = scmp.lt.s32.totalorder %s23_s16, %s23_s16 }
   0x9   :  { %p344_p3 = scmp.ne.s32.totalorder %s23_s16, %s343_s24  ;;  %p349_p5 = scmp.lt.s32.totalorder %s343_s24, %s343_s24 }
   0xb   :  { %p350_p6 = por %p349_p5, %p348_p4 }
   0xd   :  { %p351_p7 = pnand %p350_p6, %p344_p3 }
   0xf   :  { %354 = shalt.err (!%p351_p7)
}
  0x10   :  { %s382_s25 = smov 128   ;;  %s383_s26 = smov 8  }
  0x11   :  { %28 = dma.hbm_to_vmem [thread:$0]  %s480_s3, 1024, %s23_s16, [#allocation3], %s382_s25, %s382_s25, %s383_s26  }
  0x12   :  { %377 = dma.done.wait [#allocation3], 1024  }
  0x13   :  { %378 = vsyncadd [#allocation3], 4294966272  ;;  %v384_v0 = vmov 0   ;;  %v385_v1 = vmov 0.0|0.0   ;;  %v32_v2 = vld [vmem:[%s477_s0] sm:$0xff]  ;;  %v41_v3 = vld [vmem:[#allocation2] sm:$0xff]  ;;  %v33_v17 = vlaneseq }
  0x14   :  { %328 = vset.pattern.permute.xlu0 %v384_v0  ;;  %298 = vmatprep.subr.bf16.mxu0 %v385_v1  ;;  %v42_v4 = vld [vmem:[#allocation2 + $0x8] sm:$0xff]  ;;  %v43_v5 = vld [vmem:[#allocation2 + $0x10] sm:$0xff]  ;;  %v44_v6 = vld [vmem:[#allocation2 + $0x18] sm:$0xff]  ;;  %vm386_vm0 = vmmov 0   ;;  %v387_v9 = vmov 0.0   ;;  %vm49_vm1 = vcmask 523264  }
  0x15   :  { %36 = vperm.xlu0 %328, %v32_v2   ;;  %v125_v7 = vld [vmem:[%s478_s1] sm:$0xff]  ;;  %v299_v8 = vpack.c.bf16 %v42_v4, %v41_v3  ;;  %295 = vmatprep.mubr.msk.f32.mxu0 %vm386_vm0, %v387_v9  ;;  %v302_v10 = vpack.c.bf16 %v44_v6, %v43_v5  ;;  %v45_v11 = vld [vmem:[#allocation2 + $0x20] sm:$0xff]  ;;  %v46_v12 = vld [vmem:[#allocation2 + $0x28] sm:$0xff]  ;;  %v34_v18 = vand.u32 127, %v33_v17  ;;  %v388_v36 = vmov 683565275  }
  0x16   :  { %v305_v13 = vpack.c.bf16 %v46_v12, %v45_v11  ;;  %v47_v14 = vld [vmem:[#allocation2 + $0x30] sm:$0xff]  ;;  %v48_v15 = vld [vmem:[#allocation2 + $0x38] sm:$0xff]  ;;  %v389_v38 = vmov 2475754826   ;;  %v390_v41 = vmov 2131351028  }
  0x17   :  { %300 = vmatpush3.bf16.msra.mxu0 %v299_v8  ;;  %v308_v16 = vpack.c.bf16 %v48_v15, %v47_v14  ;;  %v264_v21 = vld [vmem:[%s479_s2] ss:$0 sm:$0xff]  ;;  %v265_v22 = vld [vmem:[%s479_s2 + $0x1] ss:$0 sm:$0xff]  ;;  %v391_v44 = vmov 2102212464  }
  0x18   :  { %301 = vmatprep.subr.bf16.mxu0 %v385_v1  ;;  %v392_v47 = vmov 920167782   ;;  %v393_v50 = vmov 1326507024   ;;  %vm245_vm15 = vcmask 261120   ;;  %s394_s2 = smov [#allocation5]  }
  0x19   :  { %132 = vperm.xlu0 %328, %v125_v7   ;;  %s253_s8 = sshll.u32 %s394_s2, 4  ;;  %s254_s8 = int_to_ptr.vmem [resolvable:$true] %s253_s8 }
  0x1a   :  { %s355_s9 = scalar_lea.vmem %s254_s8, 256  ;;  %p360_p9 = scmp.lt.s32.totalorder %s254_s8, %s254_s8 }
  0x1b   :  { %303 = vmatpush3.bf16.msra.mxu0 %v302_v10  ;;  %p356_p8 = scmp.ne.s32.totalorder %s254_s8, %s355_s9  ;;  %p361_p10 = scmp.lt.s32.totalorder %s355_s9, %s355_s9 }
  0x1c   :  { %304 = vmatprep.subr.bf16.mxu0 %v385_v1 }
  0x1d   :  { %p362_p11 = por %p361_p10, %p360_p9 }
  0x1f   :  { %306 = vmatpush3.bf16.msra.mxu0 %v305_v13  ;;  %p363_p12 = pnand %p362_p11, %p356_p8 }
  0x20   :  { %307 = vmatprep.subr.bf16.mxu0 %v385_v1 }
  0x23   :  { %309 = vmatpush3.bf16.msra.mxu0 %v308_v16 }
  0x94   :  { %v37_v19 = vpop.permute.xlu0 %36 }
  0x95   :  { %vm38_vm2 = vcmp.eq.s32.totalorder %v34_v18, %v37_v19 }
  0x96   :  { %v262_v20 = vsel %vm38_vm2, 1.0, %v387_v9 }
  0x97   :  { %296 = vmatmul.mubr.msk.f32.vlgmr.msra.gmra.mrb[0].mxu0 %vm49_vm1, %v262_v20 }
  0x98   :  { %v133_v23 = vpop.permute.xlu0 %132 }
  0x99   :  { %v135_v24 = vmul.f32 %v264_v21, %v133_v23 }
  0x9b   :  { %v444_v25 = vadd.f32 %v265_v22, %v135_v24 }
  0x9d   :  { %v144_v26 = vand.u32 2139095040, %v444_v25  ;;  %v141_v30 = vand.u32 2147483647, %v444_v25  ;;  %vm143_vm10 = vcmp.lt.s32.totalorder %v444_v25, 0  ;;  %vm233_vm0 = vweird.f32 %v444_v25 }
  0x9f   :  { %v145_v27 = vshrl.u32 %v144_v26, 23  ;;  %v148_v33 = vand.u32 8388607, %v141_v30  ;;  %vm142_vm11 = vcmp.le.f32.partialorder %v141_v30, 0.7853982 }
  0xa1   :  { %v266_v28 = vadd.s32 4294967169, %v145_v27  ;;  %v149_v52 = vor.u32 8388608, %v148_v33 }
  0xa3   :  { %v151_v29 = vadd.s32 1, %v266_v28  ;;  %v189_v2 = vshll.u32 %v149_v52, 8 }
  0xa5   :  { %vm152_vm3 = vcmp.gt.s32.totalorder %v151_v29, 0 }
  0xa6   :  { %v153_v31 = vsel %vm152_vm3, %v151_v29, 0 }
  0xa7   :  { %v155_v32 = vand.u32 31, %v153_v31  ;;  %v154_v35 = vshrl.u32 %v153_v31, 5 }
  0xa9   :  { %v156_v34 = vsub.s32 32, %v155_v32  ;;  %v158_v37 = vshll.u32 %v388_v36, %v155_v32  ;;  %v161_v39 = vshll.u32 %v389_v38, %v155_v32  ;;  %v164_v43 = vshll.u32 %v390_v41, %v155_v32 }
  0xaa   :  { %v167_v46 = vshll.u32 %v391_v44, %v155_v32  ;;  %v170_v49 = vshll.u32 %v392_v47, %v155_v32  ;;  %vm173_vm4 = vcmp.lt.s32.totalorder %v154_v35, 1  ;;  %vm176_vm5 = vcmp.lt.s32.totalorder %v154_v35, 4 }
  0xab   :  { %v159_v40 = vshrl.u32 %v389_v38, %v156_v34  ;;  %v162_v42 = vshrl.u32 %v390_v41, %v156_v34  ;;  %v165_v45 = vshrl.u32 %v391_v44, %v156_v34  ;;  %v168_v48 = vshrl.u32 %v392_v47, %v156_v34 }
  0xac   :  { %v171_v51 = vshrl.u32 %v393_v50, %v156_v34  ;;  %v157_v61 = vshrl.u32 %v388_v36, %v156_v34  ;;  %vm175_vm6 = vcmp.lt.s32.totalorder %v154_v35, 3  ;;  %vm174_vm7 = vcmp.lt.s32.totalorder %v154_v35, 2 }
  0xad   :  { %v160_v53 = vor.u32 %v159_v40, %v158_v37  ;;  %v163_v54 = vor.u32 %v162_v42, %v161_v39  ;;  %v166_v55 = vor.u32 %v165_v45, %v164_v43  ;;  %v169_v56 = vor.u32 %v168_v48, %v167_v46 }
  0xae   :  { %v172_v57 = vor.u32 %v171_v51, %v170_v49 }
  0xaf   :  { %v178_v58 = vsel %vm176_vm5, %v166_v55, 2102212464  ;;  %v181_v59 = vsel %vm173_vm4, %v160_v53, %v163_v54  ;;  %v185_v60 = vsel %vm173_vm4, %v163_v54, %v166_v55  ;;  %v182_v62 = vsel %vm176_vm5, %v169_v56, 920167782 }
  0xb0   :  { %v186_v63 = vsel %vm176_vm5, %v172_v57, 1326507024  ;;  %v183_v0 = vsel %vm175_vm6, %v166_v55, %v182_v62  ;;  %v177_v3 = vsel %vm173_vm4, %v157_v61, %v160_v53  ;;  %v179_v4 = vsel %vm175_vm6, %v163_v54, %v178_v58 }
  0xb1   :  { %v187_v1 = vsel %vm175_vm6, %v169_v56, %v186_v63  ;;  %v184_v5 = vsel %vm174_vm7, %v181_v59, %v183_v0  ;;  %v180_v11 = vsel %vm174_vm7, %v177_v3, %v179_v4 }
  0xb2   :  { %v188_v6 = vsel %vm174_vm7, %v185_v60, %v187_v1  ;;  %v453_v9 = vmul.u32.u64.low %v189_v2, %v184_v5  ;;  %v454_v10 = vmul.u32.u64.high %v189_v2, %v184_v5, %v453_v9  ;;  %v196_v13 = vmul.u32 %v189_v2, %v180_v11 }
  0xb3   :  { %v450_v7 = vmul.u32.u64.low %v189_v2, %v188_v6  ;;  %v451_v8 = vmul.u32.u64.high %v189_v2, %v188_v6, %v450_v7 }
  0xb4   :  { %v199_v12 = vadd.s32 1, %v454_v10 }
  0xb5   :  { %vm198_vm8 = vc.u32 %v451_v8, %v453_v9  ;;  %v197_v26 = vadd.s32 %v453_v9, %v451_v8 }
  0xb6   :  { %v200_v14 = vsel %vm198_vm8, %v199_v12, %v454_v10 }
  0xb7   :  { %v201_v15 = vadd.s32 %v200_v14, %v196_v13 }
  0xb9   :  { %v202_v16 = vadd.s32 536870912, %v201_v15 }
  0xbb   :  { %v203_v17 = vshrl.u32 %v202_v16, 30 }
  0xbd   :  { %v204_v18 = vshll.u32 %v203_v17, 30  ;;  %v227_v41 = vsub.s32 4, %v203_v17 }
  0xbf   :  { %v205_v19 = vsub.s32 %v201_v15, %v204_v18  ;;  %v228_v43 = vsel %vm143_vm10, %v227_v41, %v203_v17 }
  0xc0   :  { %v230_v44 = vsel %vm142_vm11, 0, %v228_v43 }
  0xc1   :  { %v207_v20 = vsub.s32 0, %v205_v19  ;;  %v234_v45 = vand.u32 3, %v230_v44 }
  0xc3   :  { %v267_v21 = vmin.u32 %v207_v20, %v205_v19  ;;  %vm239_vm12 = vcmp.eq.s32.totalorder %v234_v45, 2  ;;  %vm236_vm13 = vcmp.eq.s32.totalorder %v234_v45, 0  ;;  %vm235_vm14 = vcmp.lt.s32.totalorder %v234_v45, 2 }
  0xc5   :  { %v209_v22 = vclz %v267_v21 }
  0xc7   :  { %v268_v23 = vadd.s32 4294967294, %v209_v22 }
  0xc9   :  { %vm269_vm9 = vcmp.lt.s32.totalorder %v268_v23, 0 }
  0xca   :  { %v212_v24 = vsel %vm269_vm9, 0, %v268_v23 }
  0xcb   :  { %v213_v27 = vsub.s32 32, %v212_v24  ;;  %v217_v28 = vsub.s32 4294967266, %v212_v24  ;;  %v214_v29 = vshll.u32 %v205_v19, %v212_v24 }
  0xcd   :  { %v215_v31 = vshrl.u32 %v197_v26, %v213_v27  ;;  %v218_v32 = vadd.s32 127, %v217_v28 }
  0xcf   :  { %v216_v33 = vor.u32 %v215_v31, %v214_v29  ;;  %v219_v34 = vshll.u32 %v218_v32, 23 }
  0xd1   :  { %v220_v35 = vor.u32 4788187, %v219_v34  ;;  %v223_v37 = vcvt.s32.f32 %v216_v33 }
  0xd3   :  { %v221_v36 = vand.u32 2147483647, %v220_v35 }
  0xd5   :  { %v224_v38 = vmul.f32 %v223_v37, %v221_v36 }
  0xd7   :  { %v225_v39 = vxor.u32 2147483648, %v224_v38 }
  0xd9   :  { %v226_v40 = vsel %vm143_vm10, %v225_v39, %v224_v38 }
  0xda   :  { %v229_v42 = vsel %vm142_vm11, %v444_v25, %v226_v40 }
  0xdb   :  { %329 = vcosq.f32 %v229_v42 }
  0xdc   :  { %331 = vsinq.f32 %v229_v42 }
  0xe5   :  { %v330_v46 = vpop.eup %329 }
  0xe6   :  { %v332_v47 = vpop.eup %331  ;;  %v240_v48 = vxor.u32 2147483648, %v330_v46 }
  0xe7   :  { %v237_v49 = vxor.u32 2147483648, %v332_v47 }
  0xe8   :  { %v241_v50 = vsel %vm239_vm12, %v240_v48, %v332_v47 }
  0xe9   :  { %v238_v51 = vsel %vm236_vm13, %v330_v46, %v237_v49 }
  0xea   :  { %v242_v30 = vsel %vm235_vm14, %v238_v51, %v241_v50 }
  0xeb   :  { %v243_v52 = vsel %vm233_vm0, nan, %v242_v30 }
  0xec   :  { %246 = vst.msk [vmem:[#allocation5 + $0x8] sm:$0xff] %vm245_vm15, %v243_v52 }
 0x16a   :  { %v119_v53 = vpop.f32.mrb[0].mxu0 }
 0x16b   :  { %244 = vst [vmem:[#allocation5] sm:$0xff] %v119_v53  ;;  %v297_v54 = vpop.f32.mrb[1].mxu0 }
 0x16c   :  { %366 = shalt.err (!%p363_p12)
}
 0x16d   :  { %s367_s12 = scalar_lea.hbm %s481_s4, 256 }
 0x16e   :  { %p368_p13 = scmp.ne.s32.totalorder %s481_s4, %s367_s12  ;;  %p371_p0 = scmp.lt.u32.totalorder %s367_s12, %s481_s4 }
 0x170   :  { %p373_p1 = pnand %p371_p0, %p368_p13 }
 0x172   :  { %376 = shalt.err (!%p373_p1)
}
 0x173   :  { %256 = dma.vmem_to_hbm [thread:$0]  %s254_s8, 256, %s481_s4, [#allocation4]  }
 0x174   :  { %379 = dma.done.wait [#allocation4], 256  }
 0x175   :  { %380 = vsyncadd [#allocation4], 4294967040 }
 0x176   :  { %260 = vsyncpa [#allocation3], 1 }
 0x177   :  { %261 = vsyncpa [#allocation4], 1 }

</bundles_post_ra>
